<compile_context>
chip_gen: v7x
topology: tpu7x:2x2x1
jax: 0.10.0
libtpu: 0.0.40
codegen_flags: <defaults>
</compile_context>

<pallas_src>
import jax
import jax.numpy as jnp
from jax.experimental import pallas as pl
from jax.experimental.pallas import tpu as pltpu


_LANE_DENSE_WIDTH = 512              # lane-dense last dim (multiple of 128)
_TARGET_TILE_BYTES = 2 * 1024 * 1024  # ~2 MiB per tile buffer


def _scale_kernel(x_ref, o_ref):
    # Elementwise x / 255.0 on the VPU.  Compute in f32 for parity with the
    # float reference, cast back to the I/O dtype.
    x = x_ref[...]
    o_ref[...] = (x.astype(jnp.float32) / 255.0).astype(o_ref.dtype)


def simple_layer_norm_forward(x, gama=None, beta=None, eps=1e-6):
    """Pallas equivalent of Simple_LayerNorm.forward (== x / 255.0).

    gama/beta/eps mirror the module signature; the PyTorch forward ignores them.
    """
    del gama, beta, eps  # unused by the reference forward()

    # torch's `x / 255.0` promotes integer inputs to floating point.
    if not jnp.issubdtype(x.dtype, jnp.floating):
        x = x.astype(jnp.float32)

    orig_shape = x.shape
    total = int(x.size)
    if total == 0:
        return x

    itemsize = jnp.dtype(x.dtype).itemsize

    # --- lane-dense reshape --------------------------------------------------
    # The op is elementwise and layout-agnostic: flatten to (rows, C) with a
    # wide, 128-aligned last dim whenever the element count allows; otherwise
    # fall back to full-last-dim blocks (always a legal block shape).
    if total % _LANE_DENSE_WIDTH == 0:
        c = _LANE_DENSE_WIDTH
    else:
        c = orig_shape[-1]
    rows = total // c
    x2d = x.reshape(rows, c)

    # --- row tiling ----------------------------------------------------------
    # ~2 MiB per tile => double-buffered in+out stays well under the scoped
    # VMEM default on every generation (16 MiB v5e, 32 MiB v6e/v7x).
    tr = max(1, _TARGET_TILE_BYTES // (c * itemsize))
    if tr >= rows:
        tr = rows                       # single full-extent block (always legal)
    else:
        tr = max(8, (tr // 8) * 8)      # keep the sublane dim (8,)-aligned

    grid = (pl.cdiv(rows, tr),)

    out = pl.pallas_call(
        _scale_kernel,
        out_shape=jax.ShapeDtypeStruct((rows, c), x.dtype),
        grid_spec=pl.GridSpec(
            grid=grid,
            in_specs=[pl.BlockSpec((tr, c), lambda i: (i, 0))],
            out_specs=pl.BlockSpec((tr, c), lambda i: (i, 0)),
        ),
        compiler_params=pltpu.CompilerParams(
            # Row tiles are independent -> shard across both TCs on v7x.
            dimension_semantics=("parallel",),
        ),
        cost_estimate=pl.CostEstimate(
            flops=total,
            transcendentals=0,
            bytes_accessed=2 * total * itemsize,
        ),
    )(x2d)
    return out.reshape(orig_shape)


if __name__ == "__main__":
    key = jax.random.PRNGKey(0)
    batch, seq, features = 2, 8, 32

    # Deterministic parameter init mirroring the module __init__
    # (torch.ones(features), torch.zeros(features)) — unused by forward().
    gama = jnp.ones((features,), dtype=jnp.float32)
    beta = jnp.zeros((features,), dtype=jnp.float32)

    x = jax.random.normal(key, (batch, seq, features), dtype=jnp.float32) * 255.0
    y = jax.block_until_ready(simple_layer_norm_forward(x, gama, beta))

    ref = x / 255.0
    assert y.shape == x.shape and y.dtype == x.dtype
    assert jnp.max(jnp.abs(y - ref)) < 1e-5

    # Exercise the non-lane-dense fallback path (total not divisible by 512).
    x2 = jax.random.normal(jax.random.PRNGKey(1), (3, 7, 40), dtype=jnp.float32) * 255.0
    y2 = jax.block_until_ready(simple_layer_norm_forward(x2))
    assert jnp.max(jnp.abs(y2 - x2 / 255.0)) < 1e-5

    print("KERNEL_OK")
</pallas_src>

<mosaic_0001>
module attributes {stable_mosaic.version = 11 : i64} {
  func.func @_scale_kernel(%arg0: i32, %arg1: memref<1x512xf32, #tpu.memory_space<vmem>>, %arg2: memref<1x512xf32, #tpu.memory_space<vmem>>) attributes {dimension_semantics = [#tpu.dimension_semantics<parallel>], iteration_bounds = array<i64: 1>, scalar_prefetch = 0 : i64, scratch_operands = 0 : i64, tpu.core_type = #tpu.core_type<tc>, window_params = [{transform_indices = @transform_0, window_bounds = array<i64: 1, 512>}, {transform_indices = @transform_1, window_bounds = array<i64: 1, 512>}]} {
    %c0 = arith.constant 0 : index
    %c0_0 = arith.constant 0 : index
    %0 = vector.load %arg1[%c0, %c0_0] : memref<1x512xf32, #tpu.memory_space<vmem>>, vector<1x512xf32>
    %cst = arith.constant 2.550000e+02 : f32
    %1 = vector.broadcast %cst : f32 to vector<1x512xf32>
    %2 = arith.divf %0, %1 : vector<1x512xf32>
    %c0_1 = arith.constant 0 : index
    %c0_2 = arith.constant 0 : index
    %3 = vector.load %arg2[%c0_1, %c0_2] : memref<1x512xf32, #tpu.memory_space<vmem>>, vector<1x512xf32>
    tpu.vector_store %arg2[%c0_1, %c0_2], %2 {strides = array<i32>} : memref<1x512xf32, #tpu.memory_space<vmem>>, vector<1x512xf32>,
    return
  }
  func.func @transform_0(%arg0: i32) -> (i32, i32) {
    %c0_i32 = arith.constant 0 : i32
    %c0_i32_0 = arith.constant 0 : i32
    return %arg0, %c0_i32 : i32, i32
  }
  func.func @transform_1(%arg0: i32) -> (i32, i32) {
    %c0_i32 = arith.constant 0 : i32
    %c0_i32_0 = arith.constant 0 : i32
    return %arg0, %c0_i32 : i32, i32
  }
}

</mosaic_0001>

<bundles_post_ra>
// kernel: tpu_custom_call.1
= control target key start
LH: loop header
LB: loop body
LE: loop exit
PB: predicated region body
PF: predicated region fallthrough
CT: control target
= control target key end

     0   :  { %6 = vsyncpa [#allocation3], 0  ;;  %s130_s0 = inlined_call_operand.hbm [shape: f32[1,512], index: 0, kind: input, shape index: {}]   ;;  %s131_s1 = inlined_call_operand.hbm [shape: f32[1,512], index: 1, kind: output, shape index: {}]  }
   0x1   :  { %7 = vsyncpa [#allocation4], 0  ;;  %s94_s6 = smov [#allocation2]   ;;  %s46_s10 = scalar_lea.hbm %s130_s0, 64 }
   0x2   :  { %s14_s7 = sshll.u32 %s94_s6, 4  ;;  %p47_p0 = scmp.ne.s32.totalorder %s130_s0, %s46_s10  ;;  %s15_s7 = int_to_ptr.vmem [resolvable:$true] %s14_s7 }
   0x3   :  { %p50_p1 = scmp.lt.u32.totalorder %s46_s10, %s130_s0 }
   0x5   :  { %p52_p2 = pnand %p50_p1, %p47_p0 }
   0x7   :  { %55 = shalt.err (!%p52_p2)
}
   0x8   :  { %s56_s15 = scalar_lea.vmem %s15_s7, 64  ;;  %p61_p4 = scmp.lt.s32.totalorder %s15_s7, %s15_s7 }
   0x9   :  { %p57_p3 = scmp.ne.s32.totalorder %s15_s7, %s56_s15  ;;  %p62_p5 = scmp.lt.s32.totalorder %s56_s15, %s56_s15 }
   0xb   :  { %p63_p6 = por %p62_p5, %p61_p4 }
   0xd   :  { %p64_p7 = pnand %p63_p6, %p57_p3 }
   0xf   :  { %67 = shalt.err (!%p64_p7)
}
  0x10   :  { %17 = dma.hbm_to_vmem [thread:$0]  %s130_s0, 64, %s15_s7, [#allocation3]  }
  0x11   :  { %90 = dma.done.wait [#allocation3], 64  }
  0x12   :  { %91 = vsyncadd [#allocation3], 4294967232  ;;  %v24_v0 = vlaneseq  ;;  %s95_s18 = smov [#allocation5]   ;;  %v21_v1 = vld [vmem:[#allocation2] sm:$0xf] }
  0x13   :  { %s35_s19 = sshll.u32 %s95_s18, 4  ;;  %v23_v2 = vmul.f32 0.003921569, %v21_v1  ;;  %s36_s19 = int_to_ptr.vmem [resolvable:$true] %s35_s19 }
  0x14   :  { %vm26_vm0 = vcmp.lt.s32.totalorder %v24_v0, 512  ;;  %s68_s20 = scalar_lea.vmem %s36_s19, 64  ;;  %p73_p9 = scmp.lt.s32.totalorder %s36_s19, %s36_s19 }
  0x15   :  { %28 = vst.msk [vmem:[#allocation5] sm:$0xf] %vm26_vm0, %v23_v2  ;;  %p69_p8 = scmp.ne.s32.totalorder %s36_s19, %s68_s20  ;;  %p74_p10 = scmp.lt.s32.totalorder %s68_s20, %s68_s20 }
  0x17   :  { %p75_p11 = por %p74_p10, %p73_p9 }
  0x19   :  { %p76_p12 = pnand %p75_p11, %p69_p8 }
  0x1b   :  { %79 = shalt.err (!%p76_p12)
}
  0x1c   :  { %s80_s0 = scalar_lea.hbm %s131_s1, 64 }
  0x1d   :  { %p81_p13 = scmp.ne.s32.totalorder %s131_s1, %s80_s0  ;;  %p84_p0 = scmp.lt.u32.totalorder %s80_s0, %s131_s1 }
  0x1f   :  { %p86_p1 = pnand %p84_p0, %p81_p13 }
  0x21   :  { %89 = shalt.err (!%p86_p1)
}
  0x22   :  { %38 = dma.vmem_to_hbm [thread:$0]  %s36_s19, 64, %s131_s1, [#allocation4]  }
  0x23   :  { %92 = dma.done.wait [#allocation4], 64  }
  0x24   :  { %93 = vsyncadd [#allocation4], 4294967232 }
  0x25   :  { %42 = vsyncpa [#allocation3], 1 }
  0x26   :  { %43 = vsyncpa [#allocation4], 1 }

</bundles_post_ra>
